<compile_context>
chip_gen: v7x
topology: tpu7x:2x2x1
jax: 0.10.0
libtpu: 0.0.40
codegen_flags: <defaults>
</compile_context>

<pallas_src>
import functools

import jax
import jax.numpy as jnp
import numpy as np
from jax.experimental import pallas as pl
from jax.experimental.pallas import tpu as pltpu


def _round_up(x, m):
    return ((x + m - 1) // m) * m


# -----------------------------------------------------------------------------
# Kernel 1: full LSTM recurrence in a single invocation (sequential time loop)
# -----------------------------------------------------------------------------
def _lstm_seq_kernel(x_ref, wih_ref, whh_ref, b_ref, hs_ref):
    # x_ref : (T1, Bp, E)   wih_ref: (E, 4H)   whh_ref: (H, 4H)   b_ref: (1, 4H)
    # hs_ref: (T1, Bp, H)
    T1, Bp, _ = x_ref.shape
    H = whh_ref.shape[0]

    def step(t, carry):
        h, c = carry
        x_t = x_ref[t]                                           # (Bp, E)
        # Fused gate matmuls: one lane-dense (Bp, 4H) pre-activation per step.
        z = (jnp.dot(x_t, wih_ref[...], preferred_element_type=jnp.float32)
             + jnp.dot(h, whh_ref[...], preferred_element_type=jnp.float32)
             + b_ref[...])
        # PyTorch LSTM gate order: i, f, g, o
        i_g = jax.nn.sigmoid(z[:, 0 * H:1 * H])
        f_g = jax.nn.sigmoid(z[:, 1 * H:2 * H])
        g_g = jnp.tanh(z[:, 2 * H:3 * H])
        o_g = jax.nn.sigmoid(z[:, 3 * H:4 * H])
        c_new = f_g * c + i_g * g_g
        h_new = o_g * jnp.tanh(c_new)
        hs_ref[t] = h_new
        return (h_new, c_new)

    # init_hidden(): zeros for both h and c.
    h0 = jnp.zeros((Bp, H), jnp.float32)
    c0 = jnp.zeros((Bp, H), jnp.float32)
    jax.lax.fori_loop(0, T1, step, (h0, c0), unroll=True)


# -----------------------------------------------------------------------------
# Kernel 2: word decoder (Linear -> LogSoftmax), parallel over time tiles
# -----------------------------------------------------------------------------
def _decoder_kernel(hs_ref, wd_ref, bd_ref, out_ref):
    # hs_ref: (Bp, H)   wd_ref: (H, Vp)   bd_ref: (1, Vp)   out_ref: (Bp, Vp)
    logits = (jnp.dot(hs_ref[...], wd_ref[...], preferred_element_type=jnp.float32)
              + bd_ref[...])
    m = jnp.max(logits, axis=-1, keepdims=True)
    lse = m + jnp.log(jnp.sum(jnp.exp(logits - m), axis=-1, keepdims=True))
    out_ref[...] = logits - lse


# -----------------------------------------------------------------------------
# Wrapper
# -----------------------------------------------------------------------------
@functools.partial(jax.jit, static_argnames=())
def caption_gen_forward(features, words, params):
    """features: (B, E) float32, words: (B, T) int32 -> (B, T+1, V) float32."""
    emb_table = params["embedding"]           # (V, E)
    wih = params["w_ih"]                      # (4H, E)
    whh = params["w_hh"]                      # (4H, H)
    b_ih = params["b_ih"]                     # (4H,)
    b_hh = params["b_hh"]                     # (4H,)
    wd = params["dec_w"]                      # (V, H)
    bd = params["dec_b"]                      # (V,)

    B, E = features.shape
    T = words.shape[1]
    H = whh.shape[1]
    V = wd.shape[0]
    T1 = T + 1
    Bp = _round_up(B, 8)      # full sublane groups
    Vp = _round_up(V, 128)    # lane-dense vocab

    # Glue: embedding gather + prepend image embedding (plain JAX).
    embedded_words = jnp.take(emb_table, words, axis=0)                   # (B, T, E)
    x = jnp.concatenate([features[:, None, :], embedded_words], axis=1)   # (B, T1, E)
    x_seq = jnp.transpose(x, (1, 0, 2)).astype(jnp.float32)               # (T1, B, E)
    x_seq = jnp.pad(x_seq, ((0, 0), (0, Bp - B), (0, 0)))                 # (T1, Bp, E)

    # Fused-gate weights: (E, 4H) and (H, 4H); gate order (i, f, g, o) preserved.
    wih_t = wih.T.astype(jnp.float32)                                     # (E, 4H)
    whh_t = whh.T.astype(jnp.float32)                                     # (H, 4H)
    b = (b_ih + b_hh).astype(jnp.float32).reshape(1, 4 * H)               # (1, 4H)

    # Decoder padded to a lane-dense vocab; padded columns get a -1e30 bias so
    # they vanish from the softmax (sliced off after the kernel).
    wd_t = jnp.pad(wd.T.astype(jnp.float32), ((0, 0), (0, Vp - V)))        # (H, Vp)
    bd_p = jnp.concatenate(
        [bd.astype(jnp.float32), jnp.full((Vp - V,), -1e30, jnp.float32)]
    ).reshape(1, Vp)                                                       # (1, Vp)

    # ---- Kernel 1: sequential LSTM recurrence, single invocation ----
    hs = pl.pallas_call(
        _lstm_seq_kernel,
        out_shape=jax.ShapeDtypeStruct((T1, Bp, H), jnp.float32),
        grid_spec=pltpu.PrefetchScalarGridSpec(
            num_scalar_prefetch=0,
            grid=(1,),
            in_specs=[
                pl.BlockSpec((T1, Bp, E), lambda i: (0, 0, 0)),   # full sequence
                pl.BlockSpec((E, 4 * H), lambda i: (0, 0)),       # W_ih (fused gates)
                pl.BlockSpec((H, 4 * H), lambda i: (0, 0)),       # W_hh (fused gates)
                pl.BlockSpec((1, 4 * H), lambda i: (0, 0)),       # combined bias
            ],
            out_specs=pl.BlockSpec((T1, Bp, H), lambda i: (0, 0, 0)),
        ),
        compiler_params=pltpu.CompilerParams(
            dimension_semantics=("arbitrary",),   # recurrence is sequential
        ),
    )(x_seq, wih_t, whh_t, b)

    # ---- Kernel 2: decoder + log-softmax, parallel grid over time tiles ----
    out_p = pl.pallas_call(
        _decoder_kernel,
        out_shape=jax.ShapeDtypeStruct((T1, Bp, Vp), jnp.float32),
        grid_spec=pltpu.PrefetchScalarGridSpec(
            num_scalar_prefetch=0,
            grid=(T1,),
            in_specs=[
                pl.BlockSpec((None, Bp, H), lambda t: (t, 0, 0)),  # hidden states tile
                pl.BlockSpec((H, Vp), lambda t: (0, 0)),           # decoder weight^T
                pl.BlockSpec((1, Vp), lambda t: (0, 0)),           # decoder bias
            ],
            out_specs=pl.BlockSpec((None, Bp, Vp), lambda t: (t, 0, 0)),
        ),
        compiler_params=pltpu.CompilerParams(
            dimension_semantics=("parallel",),    # decoder tiles are independent
        ),
    )(hs, wd_t, bd_p)

    out = out_p[:, :B, :V]                 # drop batch / vocab padding
    return jnp.transpose(out, (1, 0, 2))   # (B, T+1, V) batch-first


# -----------------------------------------------------------------------------
# Pure-JAX reference (for correctness check)
# -----------------------------------------------------------------------------
def caption_gen_reference(features, words, params):
    emb = jnp.take(params["embedding"], words, axis=0)
    x = jnp.concatenate([features[:, None, :], emb], axis=1)   # (B, T+1, E)
    H = params["w_hh"].shape[1]
    B = features.shape[0]
    wih, whh = params["w_ih"], params["w_hh"]
    b = params["b_ih"] + params["b_hh"]

    def step(carry, x_t):
        h, c = carry
        z = x_t @ wih.T + h @ whh.T + b                        # (B, 4H)
        i = jax.nn.sigmoid(z[:, 0 * H:1 * H])
        f = jax.nn.sigmoid(z[:, 1 * H:2 * H])
        g = jnp.tanh(z[:, 2 * H:3 * H])
        o = jax.nn.sigmoid(z[:, 3 * H:4 * H])
        c = f * c + i * g
        h = o * jnp.tanh(c)
        return (h, c), h

    h0 = jnp.zeros((B, H), jnp.float32)
    c0 = jnp.zeros((B, H), jnp.float32)
    _, hs = jax.lax.scan(step, (h0, c0), jnp.transpose(x, (1, 0, 2)))
    hs = jnp.transpose(hs, (1, 0, 2))                          # (B, T+1, H)
    logits = hs @ params["dec_w"].T + params["dec_b"]
    return jax.nn.log_softmax(logits, axis=2)


# -----------------------------------------------------------------------------
# Deterministic parameter init (mirrors module shapes; synthetic, no checkpoint)
# -----------------------------------------------------------------------------
def make_params(key, embedding_dim, hidden_dim, vocab_size):
    k = jax.random.split(key, 7)
    s = 1.0 / np.sqrt(hidden_dim)
    return {
        "embedding": jax.random.uniform(k[0], (vocab_size, embedding_dim),
                                        jnp.float32, -0.2, 0.2),
        "w_ih": jax.random.uniform(k[1], (4 * hidden_dim, embedding_dim),
                                   jnp.float32, -s, s),
        "w_hh": jax.random.uniform(k[2], (4 * hidden_dim, hidden_dim),
                                   jnp.float32, -s, s),
        "b_ih": jax.random.uniform(k[3], (4 * hidden_dim,), jnp.float32, -s, s),
        "b_hh": jax.random.uniform(k[4], (4 * hidden_dim,), jnp.float32, -s, s),
        "dec_w": 0.05 * jax.random.normal(k[5], (vocab_size, hidden_dim), jnp.float32),
        "dec_b": jnp.zeros((vocab_size,), jnp.float32),
    }


if __name__ == "__main__":
    B, E, H, V, T = 4, 16, 32, 48, 7   # batch, embedding_dim, hidden_dim, vocab, seq

    root = jax.random.PRNGKey(0)
    k_feat, k_words, k_params = jax.random.split(root, 3)

    features = jax.random.normal(k_feat, (B, E), jnp.float32)
    words = jax.random.randint(k_words, (B, T), 0, V, jnp.int32)
    params = make_params(k_params, E, H, V)

    out = caption_gen_forward(features, words, params)
    out = jax.block_until_ready(out)

    ref = caption_gen_reference(features, words, params)
    np.testing.assert_allclose(np.asarray(out), np.asarray(ref), atol=1e-4, rtol=1e-4)
    assert out.shape == (B, T + 1, V)

    print("KERNEL_OK")
</pallas_src>

<mosaic_0001>
module attributes {stable_mosaic.version = 11 : i64} {
  func.func @_decoder_kernel(%arg0: i32, %arg1: memref<1x8x32xf32, #tpu.memory_space<vmem>>, %arg2: memref<32x128xf32, #tpu.memory_space<vmem>>, %arg3: memref<1x128xf32, #tpu.memory_space<vmem>>, %arg4: memref<1x8x128xf32, #tpu.memory_space<vmem>>) attributes {dimension_semantics = [#tpu.dimension_semantics<parallel>], iteration_bounds = array<i64: 8>, scalar_prefetch = 0 : i64, scratch_operands = 0 : i64, tpu.core_type = #tpu.core_type<tc>, window_params = [{transform_indices = @transform_0, window_bounds = array<i64: 1, 8, 32>}, {pipeline_mode = #tpu.pipeline_mode<synchronous>, transform_indices = @transform_1, window_bounds = array<i64: 32, 128>}, {pipeline_mode = #tpu.pipeline_mode<synchronous>, transform_indices = @transform_2, window_bounds = array<i64: 1, 128>}, {transform_indices = @transform_3, window_bounds = array<i64: 1, 8, 128>}]} {
    %c0 = arith.constant 0 : index
    %c0_0 = arith.constant 0 : index
    %c0_1 = arith.constant 0 : index
    %0 = vector.load %arg1[%c0, %c0_0, %c0_1] : memref<1x8x32xf32, #tpu.memory_space<vmem>>, vector<1x8x32xf32>
    %1 = vector.shape_cast %0 : vector<1x8x32xf32> to vector<8x32xf32>
    %c0_2 = arith.constant 0 : index
    %c0_3 = arith.constant 0 : index
    %2 = vector.load %arg2[%c0_2, %c0_3] : memref<32x128xf32, #tpu.memory_space<vmem>>, vector<32x128xf32>
    %cst = arith.constant dense<0.000000e+00> : vector<8x128xf32>
    %3 = tpu.matmul %1, %2, %cst {dimension_numbers = #tpu.dot_dimension_numbers<[1], [0], [0], [1], [0, 0, 1, 1], [], []>} : vector<8x32xf32>, vector<32x128xf32>, vector<8x128xf32> -> vector<8x128xf32>
    %c0_4 = arith.constant 0 : index
    %c0_5 = arith.constant 0 : index
    %4 = vector.load %arg3[%c0_4, %c0_5] : memref<1x128xf32, #tpu.memory_space<vmem>>, vector<1x128xf32>
    %5 = vector.broadcast %4 : vector<1x128xf32> to vector<8x128xf32>
    %6 = arith.addf %3, %5 : vector<8x128xf32>
    %cst_6 = arith.constant dense<0xFF800000> : vector<8xf32>
    %7 = vector.multi_reduction <maximumf>, %6, %cst_6 [1] : vector<8x128xf32> to vector<8xf32>
    %8 = vector.shape_cast %7 : vector<8xf32> to vector<8x1xf32>
    %9 = vector.broadcast %8 : vector<8x1xf32> to vector<8x128xf32>
    %10 = arith.subf %6, %9 : vector<8x128xf32>
    %11 = math.exp %10 : vector<8x128xf32>
    %cst_7 = arith.constant dense<0.000000e+00> : vector<8xf32>
    %12 = vector.multi_reduction <add>, %11, %cst_7 [1] : vector<8x128xf32> to vector<8xf32>
    %13 = vector.shape_cast %12 : vector<8xf32> to vector<8x1xf32>
    %14 = math.log %13 : vector<8x1xf32>
    %15 = arith.addf %8, %14 : vector<8x1xf32>
    %16 = vector.broadcast %15 : vector<8x1xf32> to vector<8x128xf32>
    %17 = arith.subf %6, %16 : vector<8x128xf32>
    %c0_8 = arith.constant 0 : index
    %c0_9 = arith.constant 0 : index
    %c0_10 = arith.constant 0 : index
    %18 = vector.load %arg4[%c0_8, %c0_9, %c0_10] : memref<1x8x128xf32, #tpu.memory_space<vmem>>, vector<1x8x128xf32>
    %19 = vector.shape_cast %18 : vector<1x8x128xf32> to vector<8x128xf32>
    %20 = vector.shape_cast %17 : vector<8x128xf32> to vector<1x8x128xf32>
    tpu.vector_store %arg4[%c0_8, %c0_9, %c0_10], %20 {strides = array<i32>} : memref<1x8x128xf32, #tpu.memory_space<vmem>>, vector<1x8x128xf32>,
    return
  }
  func.func @transform_0(%arg0: i32) -> (i32, i32, i32) {
    %c0_i32 = arith.constant 0 : i32
    %c0_i32_0 = arith.constant 0 : i32
    %c0_i32_1 = arith.constant 0 : i32
    return %arg0, %c0_i32, %c0_i32_0 : i32, i32, i32
  }
  func.func @transform_1(%arg0: i32) -> (i32, i32) {
    %c0_i32 = arith.constant 0 : i32
    %c0_i32_0 = arith.constant 0 : i32
    %c0_i32_1 = arith.constant 0 : i32
    return %c0_i32, %c0_i32_0 : i32, i32
  }
  func.func @transform_2(%arg0: i32) -> (i32, i32) {
    %c0_i32 = arith.constant 0 : i32
    %c0_i32_0 = arith.constant 0 : i32
    %c0_i32_1 = arith.constant 0 : i32
    return %c0_i32, %c0_i32_0 : i32, i32
  }
  func.func @transform_3(%arg0: i32) -> (i32, i32, i32) {
    %c0_i32 = arith.constant 0 : i32
    %c0_i32_0 = arith.constant 0 : i32
    %c0_i32_1 = arith.constant 0 : i32
    return %arg0, %c0_i32, %c0_i32_0 : i32, i32, i32
  }
}

module attributes {stable_mosaic.version = 11 : i64} {
  func.func @_lstm_seq_kernel(%arg0: i32, %arg1: memref<8x8x16xf32, #tpu.memory_space<vmem>>, %arg2: memref<16x128xf32, #tpu.memory_space<vmem>>, %arg3: memref<32x128xf32, #tpu.memory_space<vmem>>, %arg4: memref<1x128xf32, #tpu.memory_space<vmem>>, %arg5: memref<8x8x32xf32, #tpu.memory_space<vmem>>) attributes {dimension_semantics = [#tpu.dimension_semantics<arbitrary>], iteration_bounds = array<i64: 1>, scalar_prefetch = 0 : i64, scratch_operands = 0 : i64, tpu.core_type = #tpu.core_type<tc>, window_params = [{pipeline_mode = #tpu.pipeline_mode<synchronous>, transform_indices = @transform_0, window_bounds = array<i64: 8, 8, 16>}, {pipeline_mode = #tpu.pipeline_mode<synchronous>, transform_indices = @transform_1, window_bounds = array<i64: 16, 128>}, {pipeline_mode = #tpu.pipeline_mode<synchronous>, transform_indices = @transform_2, window_bounds = array<i64: 32, 128>}, {pipeline_mode = #tpu.pipeline_mode<synchronous>, transform_indices = @transform_3, window_bounds = array<i64: 1, 128>}, {pipeline_mode = #tpu.pipeline_mode<synchronous>, transform_indices = @transform_4, window_bounds = array<i64: 8, 8, 32>}]} {
    %cst = arith.constant 0.000000e+00 : f32
    %0 = vector.broadcast %cst : f32 to vector<8x32xf32>
    %cst_0 = arith.constant 0.000000e+00 : f32
    %1 = vector.broadcast %cst_0 : f32 to vector<8x32xf32>
    %c0_i32 = arith.constant 0 : i32
    %2 = arith.index_cast %c0_i32 : i32 to index
    %c0 = arith.constant 0 : index
    %c0_1 = arith.constant 0 : index
    %3 = vector.load %arg1[%2, %c0, %c0_1] : memref<8x8x16xf32, #tpu.memory_space<vmem>>, vector<1x8x16xf32>
    %4 = vector.shape_cast %3 : vector<1x8x16xf32> to vector<8x16xf32>
    %c0_2 = arith.constant 0 : index
    %c0_3 = arith.constant 0 : index
    %5 = vector.load %arg2[%c0_2, %c0_3] : memref<16x128xf32, #tpu.memory_space<vmem>>, vector<16x128xf32>
    %cst_4 = arith.constant dense<0.000000e+00> : vector<8x128xf32>
    %6 = tpu.matmul %4, %5, %cst_4 {dimension_numbers = #tpu.dot_dimension_numbers<[1], [0], [0], [1], [0, 0, 1, 1], [], []>} : vector<8x16xf32>, vector<16x128xf32>, vector<8x128xf32> -> vector<8x128xf32>
    %c0_5 = arith.constant 0 : index
    %c0_6 = arith.constant 0 : index
    %7 = vector.load %arg3[%c0_5, %c0_6] : memref<32x128xf32, #tpu.memory_space<vmem>>, vector<32x128xf32>
    %cst_7 = arith.constant dense<0.000000e+00> : vector<8x128xf32>
    %8 = tpu.matmul %0, %7, %cst_7 {dimension_numbers = #tpu.dot_dimension_numbers<[1], [0], [0], [1], [0, 0, 1, 1], [], []>} : vector<8x32xf32>, vector<32x128xf32>, vector<8x128xf32> -> vector<8x128xf32>
    %9 = arith.addf %6, %8 : vector<8x128xf32>
    %c0_8 = arith.constant 0 : index
    %c0_9 = arith.constant 0 : index
    %10 = vector.load %arg4[%c0_8, %c0_9] : memref<1x128xf32, #tpu.memory_space<vmem>>, vector<1x128xf32>
    %11 = vector.broadcast %10 : vector<1x128xf32> to vector<8x128xf32>
    %12 = arith.addf %9, %11 : vector<8x128xf32>
    %13 = vector.extract_strided_slice %12 {offsets = [0, 0], sizes = [8, 32], strides = [1, 1]} : vector<8x128xf32> to vector<8x32xf32>
    %14 = arith.negf %13 : vector<8x32xf32>
    %15 = math.exp %14 : vector<8x32xf32>
    %cst_10 = arith.constant 1.000000e+00 : f32
    %16 = vector.broadcast %cst_10 : f32 to vector<8x32xf32>
    %17 = arith.addf %16, %15 : vector<8x32xf32>
    %18 = arith.divf %16, %17 : vector<8x32xf32>
    %19 = vector.extract_strided_slice %12 {offsets = [0, 32], sizes = [8, 32], strides = [1, 1]} : vector<8x128xf32> to vector<8x32xf32>
    %20 = arith.negf %19 : vector<8x32xf32>
    %21 = math.exp %20 : vector<8x32xf32>
    %cst_11 = arith.constant 1.000000e+00 : f32
    %22 = vector.broadcast %cst_11 : f32 to vector<8x32xf32>
    %23 = arith.addf %22, %21 : vector<8x32xf32>
    %24 = arith.divf %22, %23 : vector<8x32xf32>
    %25 = vector.extract_strided_slice %12 {offsets = [0, 64], sizes = [8, 32], strides = [1, 1]} : vector<8x128xf32> to vector<8x32xf32>
    %26 = math.tanh %25 : vector<8x32xf32>
    %27 = vector.extract_strided_slice %12 {offsets = [0, 96], sizes = [8, 32], strides = [1, 1]} : vector<8x128xf32> to vector<8x32xf32>
    %28 = arith.negf %27 : vector<8x32xf32>
    %29 = math.exp %28 : vector<8x32xf32>
    %cst_12 = arith.constant 1.000000e+00 : f32
    %30 = vector.broadcast %cst_12 : f32 to vector<8x32xf32>
    %31 = arith.addf %30, %29 : vector<8x32xf32>
    %32 = arith.divf %30, %31 : vector<8x32xf32>
    %33 = arith.mulf %24, %1 : vector<8x32xf32>
    %34 = arith.mulf %18, %26 : vector<8x32xf32>
    %35 = arith.addf %33, %34 : vector<8x32xf32>
    %36 = math.tanh %35 : vector<8x32xf32>
    %37 = arith.mulf %32, %36 : vector<8x32xf32>
    %38 = arith.index_cast %c0_i32 : i32 to index
    %c0_13 = arith.constant 0 : index
    %c0_14 = arith.constant 0 : index
    %39 = vector.load %arg5[%38, %c0_13, %c0_14] : memref<8x8x32xf32, #tpu.memory_space<vmem>>, vector<1x8x32xf32>
    %40 = vector.shape_cast %39 : vector<1x8x32xf32> to vector<8x32xf32>
    %41 = vector.shape_cast %37 : vector<8x32xf32> to vector<1x8x32xf32>
    tpu.vector_store %arg5[%38, %c0_13, %c0_14], %41 {strides = array<i32>} : memref<8x8x32xf32, #tpu.memory_space<vmem>>, vector<1x8x32xf32>,
    %c1_i32 = arith.constant 1 : i32
    %42 = arith.index_cast %c1_i32 : i32 to index
    %c0_15 = arith.constant 0 : index
    %c0_16 = arith.constant 0 : index
    %43 = vector.load %arg1[%42, %c0_15, %c0_16] : memref<8x8x16xf32, #tpu.memory_space<vmem>>, vector<1x8x16xf32>
    %44 = vector.shape_cast %43 : vector<1x8x16xf32> to vector<8x16xf32>
    %c0_17 = arith.constant 0 : index
    %c0_18 = arith.constant 0 : index
    %45 = vector.load %arg2[%c0_17, %c0_18] : memref<16x128xf32, #tpu.memory_space<vmem>>, vector<16x128xf32>
    %cst_19 = arith.constant dense<0.000000e+00> : vector<8x128xf32>
    %46 = tpu.matmul %44, %45, %cst_19 {dimension_numbers = #tpu.dot_dimension_numbers<[1], [0], [0], [1], [0, 0, 1, 1], [], []>} : vector<8x16xf32>, vector<16x128xf32>, vector<8x128xf32> -> vector<8x128xf32>
    %c0_20 = arith.constant 0 : index
    %c0_21 = arith.constant 0 : index
    %47 = vector.load %arg3[%c0_20, %c0_21] : memref<32x128xf32, #tpu.memory_space<vmem>>, vector<32x128xf32>
    %cst_22 = arith.constant dense<0.000000e+00> : vector<8x128xf32>
    %48 = tpu.matmul %37, %47, %cst_22 {dimension_numbers = #tpu.dot_dimension_numbers<[1], [0], [0], [1], [0, 0, 1, 1], [], []>} : vector<8x32xf32>, vector<32x128xf32>, vector<8x128xf32> -> vector<8x128xf32>
    %49 = arith.addf %46, %48 : vector<8x128xf32>
    %c0_23 = arith.constant 0 : index
    %c0_24 = arith.constant 0 : index
    %50 = vector.load %arg4[%c0_23, %c0_24] : memref<1x128xf32, #tpu.memory_space<vmem>>, vector<1x128xf32>
    %51 = vector.broadcast %50 : vector<1x128xf32> to vector<8x128xf32>
    %52 = arith.addf %49, %51 : vector<8x128xf32>
    %53 = vector.extract_strided_slice %52 {offsets = [0, 0], sizes = [8, 32], strides = [1, 1]} : vector<8x128xf32> to vector<8x32xf32>
    %54 = arith.negf %53 : vector<8x32xf32>
    %55 = math.exp %54 : vector<8x32xf32>
    %cst_25 = arith.constant 1.000000e+00 : f32
    %56 = vector.broadcast %cst_25 : f32 to vector<8x32xf32>
    %57 = arith.addf %56, %55 : vector<8x32xf32>
    %58 = arith.divf %56, %57 : vector<8x32xf32>
    %59 = vector.extract_strided_slice %52 {offsets = [0, 32], sizes = [8, 32], strides = [1, 1]} : vector<8x128xf32> to vector<8x32xf32>
    %60 = arith.negf %59 : vector<8x32xf32>
    %61 = math.exp %60 : vector<8x32xf32>
    %cst_26 = arith.constant 1.000000e+00 : f32
    %62 = vector.broadcast %cst_26 : f32 to vector<8x32xf32>
    %63 = arith.addf %62, %61 : vector<8x32xf32>
    %64 = arith.divf %62, %63 : vector<8x32xf32>
    %65 = vector.extract_strided_slice %52 {offsets = [0, 64], sizes = [8, 32], strides = [1, 1]} : vector<8x128xf32> to vector<8x32xf32>
    %66 = math.tanh %65 : vector<8x32xf32>
    %67 = vector.extract_strided_slice %52 {offsets = [0, 96], sizes = [8, 32], strides = [1, 1]} : vector<8x128xf32> to vector<8x32xf32>
    %68 = arith.negf %67 : vector<8x32xf32>
    %69 = math.exp %68 : vector<8x32xf32>
    %cst_27 = arith.constant 1.000000e+00 : f32
    %70 = vector.broadcast %cst_27 : f32 to vector<8x32xf32>
    %71 = arith.addf %70, %69 : vector<8x32xf32>
    %72 = arith.divf %70, %71 : vector<8x32xf32>
    %73 = arith.mulf %64, %35 : vector<8x32xf32>
    %74 = arith.mulf %58, %66 : vector<8x32xf32>
    %75 = arith.addf %73, %74 : vector<8x32xf32>
    %76 = math.tanh %75 : vector<8x32xf32>
    %77 = arith.mulf %72, %76 : vector<8x32xf32>
    %78 = arith.index_cast %c1_i32 : i32 to index
    %c0_28 = arith.constant 0 : index
    %c0_29 = arith.constant 0 : index
    %79 = vector.load %arg5[%78, %c0_28, %c0_29] : memref<8x8x32xf32, #tpu.memory_space<vmem>>, vector<1x8x32xf32>
    %80 = vector.shape_cast %79 : vector<1x8x32xf32> to vector<8x32xf32>
    %81 = vector.shape_cast %77 : vector<8x32xf32> to vector<1x8x32xf32>
    tpu.vector_store %arg5[%78, %c0_28, %c0_29], %81 {strides = array<i32>} : memref<8x8x32xf32, #tpu.memory_space<vmem>>, vector<1x8x32xf32>,
    %c2_i32 = arith.constant 2 : i32
    %82 = arith.index_cast %c2_i32 : i32 to index
    %c0_30 = arith.constant 0 : index
    %c0_31 = arith.constant 0 : index
    %83 = vector.load %arg1[%82, %c0_30, %c0_31] : memref<8x8x16xf32, #tpu.memory_space<vmem>>, vector<1x8x16xf32>
    %84 = vector.shape_cast %83 : vector<1x8x16xf32> to vector<8x16xf32>
    %c0_32 = arith.constant 0 : index
    %c0_33 = arith.constant 0 : index
    %85 = vector.load %arg2[%c0_32, %c0_33] : memref<16x128xf32, #tpu.memory_space<vmem>>, vector<16x128xf32>
    %cst_34 = arith.constant dense<0.000000e+00> : vector<8x128xf32>
    %86 = tpu.matmul %84, %85, %cst_34 {dimension_numbers = #tpu.dot_dimension_numbers<[1], [0], [0], [1], [0, 0, 1, 1], [], []>} : vector<8x16xf32>, vector<16x128xf32>, vector<8x128xf32> -> vector<8x128xf32>
    %c0_35 = arith.constant 0 : index
    %c0_36 = arith.constant 0 : index
    %87 = vector.load %arg3[%c0_35, %c0_36] : memref<32x128xf32, #tpu.memory_space<vmem>>, vector<32x128xf32>
    %cst_37 = arith.constant dense<0.000000e+00> : vector<8x128xf32>
    %88 = tpu.matmul %77, %87, %cst_37 {dimension_numbers = #tpu.dot_dimension_numbers<[1], [0], [0], [1], [0, 0, 1, 1], [], []>} : vector<8x32xf32>, vector<32x128xf32>, vector<8x128xf32> -> vector<8x128xf32>
    %89 = arith.addf %86, %88 : vector<8x128xf32>
    %c0_38 = arith.constant 0 : index
    %c0_39 = arith.constant 0 : index
    %90 = vector.load %arg4[%c0_38, %c0_39] : memref<1x128xf32, #tpu.memory_space<vmem>>, vector<1x128xf32>
    %91 = vector.broadcast %90 : vector<1x128xf32> to vector<8x128xf32>
    %92 = arith.addf %89, %91 : vector<8x128xf32>
    %93 = vector.extract_strided_slice %92 {offsets = [0, 0], sizes = [8, 32], strides = [1, 1]} : vector<8x128xf32> to vector<8x32xf32>
    %94 = arith.negf %93 : vector<8x32xf32>
    %95 = math.exp %94 : vector<8x32xf32>
    %cst_40 = arith.constant 1.000000e+00 : f32
    %96 = vector.broadcast %cst_40 : f32 to vector<8x32xf32>
    %97 = arith.addf %96, %95 : vector<8x32xf32>
    %98 = arith.divf %96, %97 : vector<8x32xf32>
    %99 = vector.extract_strided_slice %92 {offsets = [0, 32], sizes = [8, 32], strides = [1, 1]} : vector<8x128xf32> to vector<8x32xf32>
    %100 = arith.negf %99 : vector<8x32xf32>
    %101 = math.exp %100 : vector<8x32xf32>
    %cst_41 = arith.constant 1.000000e+00 : f32
    %102 = vector.broadcast %cst_41 : f32 to vector<8x32xf32>
    %103 = arith.addf %102, %101 : vector<8x32xf32>
    %104 = arith.divf %102, %103 : vector<8x32xf32>
    %105 = vector.extract_strided_slice %92 {offsets = [0, 64], sizes = [8, 32], strides = [1, 1]} : vector<8x128xf32> to vector<8x32xf32>
    %106 = math.tanh %105 : vector<8x32xf32>
    %107 = vector.extract_strided_slice %92 {offsets = [0, 96], sizes = [8, 32], strides = [1, 1]} : vector<8x128xf32> to vector<8x32xf32>
    %108 = arith.negf %107 : vector<8x32xf32>
    %109 = math.exp %108 : vector<8x32xf32>
    %cst_42 = arith.constant 1.000000e+00 : f32
    %110 = vector.broadcast %cst_42 : f32 to vector<8x32xf32>
    %111 = arith.addf %110, %109 : vector<8x32xf32>
    %112 = arith.divf %110, %111 : vector<8x32xf32>
    %113 = arith.mulf %104, %75 : vector<8x32xf32>
    %114 = arith.mulf %98, %106 : vector<8x32xf32>
    %115 = arith.addf %113, %114 : vector<8x32xf32>
    %116 = math.tanh %115 : vector<8x32xf32>
    %117 = arith.mulf %112, %116 : vector<8x32xf32>
    %118 = arith.index_cast %c2_i32 : i32 to index
    %c0_43 = arith.constant 0 : index
    %c0_44 = arith.constant 0 : index
    %119 = vector.load %arg5[%118, %c0_43, %c0_44] : memref<8x8x32xf32, #tpu.memory_space<vmem>>, vector<1x8x32xf32>
    %120 = vector.shape_cast %119 : vector<1x8x32xf32> to vector<8x32xf32>
    %121 = vector.shape_cast %117 : vector<8x32xf32> to vector<1x8x32xf32>
    tpu.vector_store %arg5[%118, %c0_43, %c0_44], %121 {strides = array<i32>} : memref<8x8x32xf32, #tpu.memory_space<vmem>>, vector<1x8x32xf32>,
    %c3_i32 = arith.constant 3 : i32
    %122 = arith.index_cast %c3_i32 : i32 to index
    %c0_45 = arith.constant 0 : index
    %c0_46 = arith.constant 0 : index
    %123 = vector.load %arg1[%122, %c0_45, %c0_46] : memref<8x8x16xf32, #tpu.memory_space<vmem>>, vector<1x8x16xf32>
    %124 = vector.shape_cast %123 : vector<1x8x16xf32> to vector<8x16xf32>
    %c0_47 = arith.constant 0 : index
    %c0_48 = arith.constant 0 : index
    %125 = vector.load %arg2[%c0_47, %c0_48] : memref<16x128xf32, #tpu.memory_space<vmem>>, vector<16x128xf32>
    %cst_49 = arith.constant dense<0.000000e+00> : vector<8x128xf32>
    %126 = tpu.matmul %124, %125, %cst_49 {dimension_numbers = #tpu.dot_dimension_numbers<[1], [0], [0], [1], [0, 0, 1, 1], [], []>} : vector<8x16xf32>, vector<16x128xf32>, vector<8x128xf32> -> vector<8x128xf32>
    %c0_50 = arith.constant 0 : index
    %c0_51 = arith.constant 0 : index
    %127 = vector.load %arg3[%c0_50, %c0_51] : memref<32x128xf32, #tpu.memory_space<vmem>>, vector<32x128xf32>
    %cst_52 = arith.constant dense<0.000000e+00> : vector<8x128xf32>
    %128 = tpu.matmul %117, %127, %cst_52 {dimension_numbers = #tpu.dot_dimension_numbers<[1], [0], [0], [1], [0, 0, 1, 1], [], []>} : vector<8x32xf32>, vector<32x128xf32>, vector<8x128xf32> -> vector<8x128xf32>
    %129 = arith.addf %126, %128 : vector<8x128xf32>
    %c0_53 = arith.constant 0 : index
    %c0_54 = arith.constant 0 : index
    %130 = vector.load %arg4[%c0_53, %c0_54] : memref<1x128xf32, #tpu.memory_space<vmem>>, vector<1x128xf32>
    %131 = vector.broadcast %130 : vector<1x128xf32> to vector<8x128xf32>
    %132 = arith.addf %129, %131 : vector<8x128xf32>
    %133 = vector.extract_strided_slice %132 {offsets = [0, 0], sizes = [8, 32], strides = [1, 1]} : vector<8x128xf32> to vector<8x32xf32>
    %134 = arith.negf %133 : vector<8x32xf32>
    %135 = math.exp %134 : vector<8x32xf32>
    %cst_55 = arith.constant 1.000000e+00 : f32
    %136 = vector.broadcast %cst_55 : f32 to vector<8x32xf32>
    %137 = arith.addf %136, %135 : vector<8x32xf32>
    %138 = arith.divf %136, %137 : vector<8x32xf32>
    %139 = vector.extract_strided_slice %132 {offsets = [0, 32], sizes = [8, 32], strides = [1, 1]} : vector<8x128xf32> to vector<8x32xf32>
    %140 = arith.negf %139 : vector<8x32xf32>
    %141 = math.exp %140 : vector<8x32xf32>
    %cst_56 = arith.constant 1.000000e+00 : f32
    %142 = vector.broadcast %cst_56 : f32 to vector<8x32xf32>
    %143 = arith.addf %142, %141 : vector<8x32xf32>
    %144 = arith.divf %142, %143 : vector<8x32xf32>
    %145 = vector.extract_strided_slice %132 {offsets = [0, 64], sizes = [8, 32], strides = [1, 1]} : vector<8x128xf32> to vector<8x32xf32>
    %146 = math.tanh %145 : vector<8x32xf32>
    %147 = vector.extract_strided_slice %132 {offsets = [0, 96], sizes = [8, 32], strides = [1, 1]} : vector<8x128xf32> to vector<8x32xf32>
    %148 = arith.negf %147 : vector<8x32xf32>
    %149 = math.exp %148 : vector<8x32xf32>
    %cst_57 = arith.constant 1.000000e+00 : f32
    %150 = vector.broadcast %cst_57 : f32 to vector<8x32xf32>
    %151 = arith.addf %150, %149 : vector<8x32xf32>
    %152 = arith.divf %150, %151 : vector<8x32xf32>
    %153 = arith.mulf %144, %115 : vector<8x32xf32>
    %154 = arith.mulf %138, %146 : vector<8x32xf32>
    %155 = arith.addf %153, %154 : vector<8x32xf32>
    %156 = math.tanh %155 : vector<8x32xf32>
    %157 = arith.mulf %152, %156 : vector<8x32xf32>
    %158 = arith.index_cast %c3_i32 : i32 to index
    %c0_58 = arith.constant 0 : index
    %c0_59 = arith.constant 0 : index
    %159 = vector.load %arg5[%158, %c0_58, %c0_59] : memref<8x8x32xf32, #tpu.memory_space<vmem>>, vector<1x8x32xf32>
    %160 = vector.shape_cast %159 : vector<1x8x32xf32> to vector<8x32xf32>
    %161 = vector.shape_cast %157 : vector<8x32xf32> to vector<1x8x32xf32>
    tpu.vector_store %arg5[%158, %c0_58, %c0_59], %161 {strides = array<i32>} : memref<8x8x32xf32, #tpu.memory_space<vmem>>, vector<1x8x32xf32>,
    %c4_i32 = arith.constant 4 : i32
    %162 = arith.index_cast %c4_i32 : i32 to index
    %c0_60 = arith.constant 0 : index
    %c0_61 = arith.constant 0 : index
    %163 = vector.load %arg1[%162, %c0_60, %c0_61] : memref<8x8x16xf32, #tpu.memory_space<vmem>>, vector<1x8x16xf32>
    %164 = vector.shape_cast %163 : vector<1x8x16xf32> to vector<8x16xf32>
    %c0_62 = arith.constant 0 : index
    %c0_63 = arith.constant 0 : index
    %165 = vector.load %arg2[%c0_62, %c0_63] : memref<16x128xf32, #tpu.memory_space<vmem>>, vector<16x128xf32>
    %cst_64 = arith.constant dense<0.000000e+00> : vector<8x128xf32>
    %166 = tpu.matmul %164, %165, %cst_64 {dimension_numbers = #tpu.dot_dimension_numbers<[1], [0], [0], [1], [0, 0, 1, 1], [], []>} : vector<8x16xf32>, vector<16x128xf32>, vector<8x128xf32> -> vector<8x128xf32>
    %c0_65 = arith.constant 0 : index
    %c0_66 = arith.constant 0 : index
    %167 = vector.load %arg3[%c0_65, %c0_66] : memref<32x128xf32, #tpu.memory_space<vmem>>, vector<32x128xf32>
    %cst_67 = arith.constant dense<0.000000e+00> : vector<8x128xf32>
    %168 = tpu.matmul %157, %167, %cst_67 {dimension_numbers = #tpu.dot_dimension_numbers<[1], [0], [0], [1], [0, 0, 1, 1], [], []>} : vector<8x32xf32>, vector<32x128xf32>, vector<8x128xf32> -> vector<8x128xf32>
    %169 = arith.addf %166, %168 : vector<8x128xf32>
    %c0_68 = arith.constant 0 : index
    %c0_69 = arith.constant 0 : index
    %170 = vector.load %arg4[%c0_68, %c0_69] : memref<1x128xf32, #tpu.memory_space<vmem>>, vector<1x128xf32>
    %171 = vector.broadcast %170 : vector<1x128xf32> to vector<8x128xf32>
    %172 = arith.addf %169, %171 : vector<8x128xf32>
    %173 = vector.extract_strided_slice %172 {offsets = [0, 0], sizes = [8, 32], strides = [1, 1]} : vector<8x128xf32> to vector<8x32xf32>
    %174 = arith.negf %173 : vector<8x32xf32>
    %175 = math.exp %174 : vector<8x32xf32>
    %cst_70 = arith.constant 1.000000e+00 : f32
    %176 = vector.broadcast %cst_70 : f32 to vector<8x32xf32>
    %177 = arith.addf %176, %175 : vector<8x32xf32>
    %178 = arith.divf %176, %177 : vector<8x32xf32>
    %179 = vector.extract_strided_slice %172 {offsets = [0, 32], sizes = [8, 32], strides = [1, 1]} : vector<8x128xf32> to vector<8x32xf32>
    %180 = arith.negf %179 : vector<8x32xf32>
    %181 = math.exp %180 : vector<8x32xf32>
    %cst_71 = arith.constant 1.000000e+00 : f32
    %182 = vector.broadcast %cst_71 : f32 to vector<8x32xf32>
    %183 = arith.addf %182, %181 : vector<8x32xf32>
    %184 = arith.divf %182, %183 : vector<8x32xf32>
    %185 = vector.extract_strided_slice %172 {offsets = [0, 64], sizes = [8, 32], strides = [1, 1]} : vector<8x128xf32> to vector<8x32xf32>
    %186 = math.tanh %185 : vector<8x32xf32>
    %187 = vector.extract_strided_slice %172 {offsets = [0, 96], sizes = [8, 32], strides = [1, 1]} : vector<8x128xf32> to vector<8x32xf32>
    %188 = arith.negf %187 : vector<8x32xf32>
    %189 = math.exp %188 : vector<8x32xf32>
    %cst_72 = arith.constant 1.000000e+00 : f32
    %190 = vector.broadcast %cst_72 : f32 to vector<8x32xf32>
    %191 = arith.addf %190, %189 : vector<8x32xf32>
    %192 = arith.divf %190, %191 : vector<8x32xf32>
    %193 = arith.mulf %184, %155 : vector<8x32xf32>
    %194 = arith.mulf %178, %186 : vector<8x32xf32>
    %195 = arith.addf %193, %194 : vector<8x32xf32>
    %196 = math.tanh %195 : vector<8x32xf32>
    %197 = arith.mulf %192, %196 : vector<8x32xf32>
    %198 = arith.index_cast %c4_i32 : i32 to index
    %c0_73 = arith.constant 0 : index
    %c0_74 = arith.constant 0 : index
    %199 = vector.load %arg5[%198, %c0_73, %c0_74] : memref<8x8x32xf32, #tpu.memory_space<vmem>>, vector<1x8x32xf32>
    %200 = vector.shape_cast %199 : vector<1x8x32xf32> to vector<8x32xf32>
    %201 = vector.shape_cast %197 : vector<8x32xf32> to vector<1x8x32xf32>
    tpu.vector_store %arg5[%198, %c0_73, %c0_74], %201 {strides = array<i32>} : memref<8x8x32xf32, #tpu.memory_space<vmem>>, vector<1x8x32xf32>,
    %c5_i32 = arith.constant 5 : i32
    %202 = arith.index_cast %c5_i32 : i32 to index
    %c0_75 = arith.constant 0 : index
    %c0_76 = arith.constant 0 : index
    %203 = vector.load %arg1[%202, %c0_75, %c0_76] : memref<8x8x16xf32, #tpu.memory_space<vmem>>, vector<1x8x16xf32>
    %204 = vector.shape_cast %203 : vector<1x8x16xf32> to vector<8x16xf32>
    %c0_77 = arith.constant 0 : index
    %c0_78 = arith.constant 0 : index
    %205 = vector.load %arg2[%c0_77, %c0_78] : memref<16x128xf32, #tpu.memory_space<vmem>>, vector<16x128xf32>
    %cst_79 = arith.constant dense<0.000000e+00> : vector<8x128xf32>
    %206 = tpu.matmul %204, %205, %cst_79 {dimension_numbers = #tpu.dot_dimension_numbers<[1], [0], [0], [1], [0, 0, 1, 1], [], []>} : vector<8x16xf32>, vector<16x128xf32>, vector<8x128xf32> -> vector<8x128xf32>
    %c0_80 = arith.constant 0 : index
    %c0_81 = arith.constant 0 : index
    %207 = vector.load %arg3[%c0_80, %c0_81] : memref<32x128xf32, #tpu.memory_space<vmem>>, vector<32x128xf32>
    %cst_82 = arith.constant dense<0.000000e+00> : vector<8x128xf32>
    %208 = tpu.matmul %197, %207, %cst_82 {dimension_numbers = #tpu.dot_dimension_numbers<[1], [0], [0], [1], [0, 0, 1, 1], [], []>} : vector<8x32xf32>, vector<32x128xf32>, vector<8x128xf32> -> vector<8x128xf32>
    %209 = arith.addf %206, %208 : vector<8x128xf32>
    %c0_83 = arith.constant 0 : index
    %c0_84 = arith.constant 0 : index
    %210 = vector.load %arg4[%c0_83, %c0_84] : memref<1x128xf32, #tpu.memory_space<vmem>>, vector<1x128xf32>
    %211 = vector.broadcast %210 : vector<1x128xf32> to vector<8x128xf32>
    %212 = arith.addf %209, %211 : vector<8x128xf32>
    %213 = vector.extract_strided_slice %212 {offsets = [0, 0], sizes = [8, 32], strides = [1, 1]} : vector<8x128xf32> to vector<8x32xf32>
    %214 = arith.negf %213 : vector<8x32xf32>
    %215 = math.exp %214 : vector<8x32xf32>
    %cst_85 = arith.constant 1.000000e+00 : f32
    %216 = vector.broadcast %cst_85 : f32 to vector<8x32xf32>
    %217 = arith.addf %216, %215 : vector<8x32xf32>
    %218 = arith.divf %216, %217 : vector<8x32xf32>
    %219 = vector.extract_strided_slice %212 {offsets = [0, 32], sizes = [8, 32], strides = [1, 1]} : vector<8x128xf32> to vector<8x32xf32>
    %220 = arith.negf %219 : vector<8x32xf32>
    %221 = math.exp %220 : vector<8x32xf32>
    %cst_86 = arith.constant 1.000000e+00 : f32
    %222 = vector.broadcast %cst_86 : f32 to vector<8x32xf32>
    %223 = arith.addf %222, %221 : vector<8x32xf32>
    %224 = arith.divf %222, %223 : vector<8x32xf32>
    %225 = vector.extract_strided_slice %212 {offsets = [0, 64], sizes = [8, 32], strides = [1, 1]} : vector<8x128xf32> to vector<8x32xf32>
    %226 = math.tanh %225 : vector<8x32xf32>
    %227 = vector.extract_strided_slice %212 {offsets = [0, 96], sizes = [8, 32], strides = [1, 1]} : vector<8x128xf32> to vector<8x32xf32>
    %228 = arith.negf %227 : vector<8x32xf32>
    %229 = math.exp %228 : vector<8x32xf32>
    %cst_87 = arith.constant 1.000000e+00 : f32
    %230 = vector.broadcast %cst_87 : f32 to vector<8x32xf32>
    %231 = arith.addf %230, %229 : vector<8x32xf32>
    %232 = arith.divf %230, %231 : vector<8x32xf32>
    %233 = arith.mulf %224, %195 : vector<8x32xf32>
    %234 = arith.mulf %218, %226 : vector<8x32xf32>
    %235 = arith.addf %233, %234 : vector<8x32xf32>
    %236 = math.tanh %235 : vector<8x32xf32>
    %237 = arith.mulf %232, %236 : vector<8x32xf32>
    %238 = arith.index_cast %c5_i32 : i32 to index
    %c0_88 = arith.constant 0 : index
    %c0_89 = arith.constant 0 : index
    %239 = vector.load %arg5[%238, %c0_88, %c0_89] : memref<8x8x32xf32, #tpu.memory_space<vmem>>, vector<1x8x32xf32>
    %240 = vector.shape_cast %239 : vector<1x8x32xf32> to vector<8x32xf32>
    %241 = vector.shape_cast %237 : vector<8x32xf32> to vector<1x8x32xf32>
    tpu.vector_store %arg5[%238, %c0_88, %c0_89], %241 {strides = array<i32>} : memref<8x8x32xf32, #tpu.memory_space<vmem>>, vector<1x8x32xf32>,
    %c6_i32 = arith.constant 6 : i32
    %242 = arith.index_cast %c6_i32 : i32 to index
    %c0_90 = arith.constant 0 : index
    %c0_91 = arith.constant 0 : index
    %243 = vector.load %arg1[%242, %c0_90, %c0_91] : memref<8x8x16xf32, #tpu.memory_space<vmem>>, vector<1x8x16xf32>
    %244 = vector.shape_cast %243 : vector<1x8x16xf32> to vector<8x16xf32>
    %c0_92 = arith.constant 0 : index
    %c0_93 = arith.constant 0 : index
    %245 = vector.load %arg2[%c0_92, %c0_93] : memref<16x128xf32, #tpu.memory_space<vmem>>, vector<16x128xf32>
    %cst_94 = arith.constant dense<0.000000e+00> : vector<8x128xf32>
    %246 = tpu.matmul %244, %245, %cst_94 {dimension_numbers = #tpu.dot_dimension_numbers<[1], [0], [0], [1], [0, 0, 1, 1], [], []>} : vector<8x16xf32>, vector<16x128xf32>, vector<8x128xf32> -> vector<8x128xf32>
    %c0_95 = arith.constant 0 : index
    %c0_96 = arith.constant 0 : index
    %247 = vector.load %arg3[%c0_95, %c0_96] : memref<32x128xf32, #tpu.memory_space<vmem>>, vector<32x128xf32>
    %cst_97 = arith.constant dense<0.000000e+00> : vector<8x128xf32>
    %248 = tpu.matmul %237, %247, %cst_97 {dimension_numbers = #tpu.dot_dimension_numbers<[1], [0], [0], [1], [0, 0, 1, 1], [], []>} : vector<8x32xf32>, vector<32x128xf32>, vector<8x128xf32> -> vector<8x128xf32>
    %249 = arith.addf %246, %248 : vector<8x128xf32>
    %c0_98 = arith.constant 0 : index
    %c0_99 = arith.constant 0 : index
    %250 = vector.load %arg4[%c0_98, %c0_99] : memref<1x128xf32, #tpu.memory_space<vmem>>, vector<1x128xf32>
    %251 = vector.broadcast %250 : vector<1x128xf32> to vector<8x128xf32>
    %252 = arith.addf %249, %251 : vector<8x128xf32>
    %253 = vector.extract_strided_slice %252 {offsets = [0, 0], sizes = [8, 32], strides = [1, 1]} : vector<8x128xf32> to vector<8x32xf32>
    %254 = arith.negf %253 : vector<8x32xf32>
    %255 = math.exp %254 : vector<8x32xf32>
    %cst_100 = arith.constant 1.000000e+00 : f32
    %256 = vector.broadcast %cst_100 : f32 to vector<8x32xf32>
    %257 = arith.addf %256, %255 : vector<8x32xf32>
    %258 = arith.divf %256, %257 : vector<8x32xf32>
    %259 = vector.extract_strided_slice %252 {offsets = [0, 32], sizes = [8, 32], strides = [1, 1]} : vector<8x128xf32> to vector<8x32xf32>
    %260 = arith.negf %259 : vector<8x32xf32>
    %261 = math.exp %260 : vector<8x32xf32>
    %cst_101 = arith.constant 1.000000e+00 : f32
    %262 = vector.broadcast %cst_101 : f32 to vector<8x32xf32>
    %263 = arith.addf %262, %261 : vector<8x32xf32>
    %264 = arith.divf %262, %263 : vector<8x32xf32>
    %265 = vector.extract_strided_slice %252 {offsets = [0, 64], sizes = [8, 32], strides = [1, 1]} : vector<8x128xf32> to vector<8x32xf32>
    %266 = math.tanh %265 : vector<8x32xf32>
    %267 = vector.extract_strided_slice %252 {offsets = [0, 96], sizes = [8, 32], strides = [1, 1]} : vector<8x128xf32> to vector<8x32xf32>
    %268 = arith.negf %267 : vector<8x32xf32>
    %269 = math.exp %268 : vector<8x32xf32>
    %cst_102 = arith.constant 1.000000e+00 : f32
    %270 = vector.broadcast %cst_102 : f32 to vector<8x32xf32>
    %271 = arith.addf %270, %269 : vector<8x32xf32>
    %272 = arith.divf %270, %271 : vector<8x32xf32>
    %273 = arith.mulf %264, %235 : vector<8x32xf32>
    %274 = arith.mulf %258, %266 : vector<8x32xf32>
    %275 = arith.addf %273, %274 : vector<8x32xf32>
    %276 = math.tanh %275 : vector<8x32xf32>
    %277 = arith.mulf %272, %276 : vector<8x32xf32>
    %278 = arith.index_cast %c6_i32 : i32 to index
    %c0_103 = arith.constant 0 : index
    %c0_104 = arith.constant 0 : index
    %279 = vector.load %arg5[%278, %c0_103, %c0_104] : memref<8x8x32xf32, #tpu.memory_space<vmem>>, vector<1x8x32xf32>
    %280 = vector.shape_cast %279 : vector<1x8x32xf32> to vector<8x32xf32>
    %281 = vector.shape_cast %277 : vector<8x32xf32> to vector<1x8x32xf32>
    tpu.vector_store %arg5[%278, %c0_103, %c0_104], %281 {strides = array<i32>} : memref<8x8x32xf32, #tpu.memory_space<vmem>>, vector<1x8x32xf32>,
    %c7_i32 = arith.constant 7 : i32
    %282 = arith.index_cast %c7_i32 : i32 to index
    %c0_105 = arith.constant 0 : index
    %c0_106 = arith.constant 0 : index
    %283 = vector.load %arg1[%282, %c0_105, %c0_106] : memref<8x8x16xf32, #tpu.memory_space<vmem>>, vector<1x8x16xf32>
    %284 = vector.shape_cast %283 : vector<1x8x16xf32> to vector<8x16xf32>
    %c0_107 = arith.constant 0 : index
    %c0_108 = arith.constant 0 : index
    %285 = vector.load %arg2[%c0_107, %c0_108] : memref<16x128xf32, #tpu.memory_space<vmem>>, vector<16x128xf32>
    %cst_109 = arith.constant dense<0.000000e+00> : vector<8x128xf32>
    %286 = tpu.matmul %284, %285, %cst_109 {dimension_numbers = #tpu.dot_dimension_numbers<[1], [0], [0], [1], [0, 0, 1, 1], [], []>} : vector<8x16xf32>, vector<16x128xf32>, vector<8x128xf32> -> vector<8x128xf32>
    %c0_110 = arith.constant 0 : index
    %c0_111 = arith.constant 0 : index
    %287 = vector.load %arg3[%c0_110, %c0_111] : memref<32x128xf32, #tpu.memory_space<vmem>>, vector<32x128xf32>
    %cst_112 = arith.constant dense<0.000000e+00> : vector<8x128xf32>
    %288 = tpu.matmul %277, %287, %cst_112 {dimension_numbers = #tpu.dot_dimension_numbers<[1], [0], [0], [1], [0, 0, 1, 1], [], []>} : vector<8x32xf32>, vector<32x128xf32>, vector<8x128xf32> -> vector<8x128xf32>
    %289 = arith.addf %286, %288 : vector<8x128xf32>
    %c0_113 = arith.constant 0 : index
    %c0_114 = arith.constant 0 : index
    %290 = vector.load %arg4[%c0_113, %c0_114] : memref<1x128xf32, #tpu.memory_space<vmem>>, vector<1x128xf32>
    %291 = vector.broadcast %290 : vector<1x128xf32> to vector<8x128xf32>
    %292 = arith.addf %289, %291 : vector<8x128xf32>
    %293 = vector.extract_strided_slice %292 {offsets = [0, 0], sizes = [8, 32], strides = [1, 1]} : vector<8x128xf32> to vector<8x32xf32>
    %294 = arith.negf %293 : vector<8x32xf32>
    %295 = math.exp %294 : vector<8x32xf32>
    %cst_115 = arith.constant 1.000000e+00 : f32
    %296 = vector.broadcast %cst_115 : f32 to vector<8x32xf32>
    %297 = arith.addf %296, %295 : vector<8x32xf32>
    %298 = arith.divf %296, %297 : vector<8x32xf32>
    %299 = vector.extract_strided_slice %292 {offsets = [0, 32], sizes = [8, 32], strides = [1, 1]} : vector<8x128xf32> to vector<8x32xf32>
    %300 = arith.negf %299 : vector<8x32xf32>
    %301 = math.exp %300 : vector<8x32xf32>
    %cst_116 = arith.constant 1.000000e+00 : f32
    %302 = vector.broadcast %cst_116 : f32 to vector<8x32xf32>
    %303 = arith.addf %302, %301 : vector<8x32xf32>
    %304 = arith.divf %302, %303 : vector<8x32xf32>
    %305 = vector.extract_strided_slice %292 {offsets = [0, 64], sizes = [8, 32], strides = [1, 1]} : vector<8x128xf32> to vector<8x32xf32>
    %306 = math.tanh %305 : vector<8x32xf32>
    %307 = vector.extract_strided_slice %292 {offsets = [0, 96], sizes = [8, 32], strides = [1, 1]} : vector<8x128xf32> to vector<8x32xf32>
    %308 = arith.negf %307 : vector<8x32xf32>
    %309 = math.exp %308 : vector<8x32xf32>
    %cst_117 = arith.constant 1.000000e+00 : f32
    %310 = vector.broadcast %cst_117 : f32 to vector<8x32xf32>
    %311 = arith.addf %310, %309 : vector<8x32xf32>
    %312 = arith.divf %310, %311 : vector<8x32xf32>
    %313 = arith.mulf %304, %275 : vector<8x32xf32>
    %314 = arith.mulf %298, %306 : vector<8x32xf32>
    %315 = arith.addf %313, %314 : vector<8x32xf32>
    %316 = math.tanh %315 : vector<8x32xf32>
    %317 = arith.mulf %312, %316 : vector<8x32xf32>
    %318 = arith.index_cast %c7_i32 : i32 to index
    %c0_118 = arith.constant 0 : index
    %c0_119 = arith.constant 0 : index
    %319 = vector.load %arg5[%318, %c0_118, %c0_119] : memref<8x8x32xf32, #tpu.memory_space<vmem>>, vector<1x8x32xf32>
    %320 = vector.shape_cast %319 : vector<1x8x32xf32> to vector<8x32xf32>
    %321 = vector.shape_cast %317 : vector<8x32xf32> to vector<1x8x32xf32>
    tpu.vector_store %arg5[%318, %c0_118, %c0_119], %321 {strides = array<i32>} : memref<8x8x32xf32, #tpu.memory_space<vmem>>, vector<1x8x32xf32>,
    %c8_i32 = arith.constant 8 : i32
    return
  }
  func.func @transform_0(%arg0: i32) -> (i32, i32, i32) {
    %c0_i32 = arith.constant 0 : i32
    %c0_i32_0 = arith.constant 0 : i32
    %c0_i32_1 = arith.constant 0 : i32
    %c0_i32_2 = arith.constant 0 : i32
    return %c0_i32, %c0_i32_0, %c0_i32_1 : i32, i32, i32
  }
  func.func @transform_1(%arg0: i32) -> (i32, i32) {
    %c0_i32 = arith.constant 0 : i32
    %c0_i32_0 = arith.constant 0 : i32
    %c0_i32_1 = arith.constant 0 : i32
    return %c0_i32, %c0_i32_0 : i32, i32
  }
  func.func @transform_2(%arg0: i32) -> (i32, i32) {
    %c0_i32 = arith.constant 0 : i32
    %c0_i32_0 = arith.constant 0 : i32
    %c0_i32_1 = arith.constant 0 : i32
    return %c0_i32, %c0_i32_0 : i32, i32
  }
  func.func @transform_3(%arg0: i32) -> (i32, i32) {
    %c0_i32 = arith.constant 0 : i32
    %c0_i32_0 = arith.constant 0 : i32
    %c0_i32_1 = arith.constant 0 : i32
    return %c0_i32, %c0_i32_0 : i32, i32
  }
  func.func @transform_4(%arg0: i32) -> (i32, i32, i32) {
    %c0_i32 = arith.constant 0 : i32
    %c0_i32_0 = arith.constant 0 : i32
    %c0_i32_1 = arith.constant 0 : i32
    %c0_i32_2 = arith.constant 0 : i32
    return %c0_i32, %c0_i32_0, %c0_i32_1 : i32, i32, i32
  }
}

</mosaic_0001>

<bundles_post_ra>
// kernel: caption_gen_forward.3
= control target key start
LH: loop header
LB: loop body
LE: loop exit
PB: predicated region body
PF: predicated region fallthrough
CT: control target
= control target key end

     0   :  { %s396_s12 = smov 0   ;;  %s428_s0 = inlined_call_operand.vmem [shape: f32[8,8,32], index: 0, kind: input, shape index: {}]   ;;  %s429_s1 = inlined_call_operand.vmem [shape: f32[32,128], index: 1, kind: input, shape index: {}]   ;;  %s430_s2 = inlined_call_operand.vmem [shape: f32[1,128], index: 2, kind: input, shape index: {}]   ;;  %s431_s3 = inlined_call_operand.vmem [shape: f32[8,8,128], index: 3, kind: output, shape index: {}]  }
   0x1 LB: > { %s317_s13 = sadd.s32 4294967295, %s371_s12   ;;  %p321_p0 = scmp.ge.s32.totalorder %s371_s12, 1  ;;  %s371_s12 = sphi %s396_s12, %s13_s12  }
   0x2   : > { %p136_p1 = scmp.lt.s32.totalorder %s371_s12, 9 }
   0x4   : > { %p137_p2 = pnand %p321_p0, %p136_p1 }
   0x5   : > { %v167_v0 = vld [vmem:[%s429_s1] sm:$0xff] (!%p137_p2)  ;;  %v168_v1 = vld [vmem:[%s429_s1 + $0x8] sm:$0xff] (!%p137_p2)  ;;  %v169_v2 = vld [vmem:[%s429_s1 + $0x10] sm:$0xff] (!%p137_p2)  ;;  %v373_v3 = vmov (!%p137_p2), 0.0|0.0   ;;  %vm374_vm0 = vmmov (!%p137_p2), 0   ;;  %v375_v6 = vmov (!%p137_p2), 0.0  }
   0x6   : > { %140 = sbr.rel (%p137_p2) target bundleno = 548 (0x224), region = 32  ;;  %344 = vmatprep.subr.bf16.mxu0 (!%p137_p2), %v373_v3  ;;  %v345_v4 = vpack.c.bf16 (!%p137_p2), %v168_v1, %v167_v0  ;;  %v170_v5 = vld [vmem:[%s429_s1 + $0x18] sm:$0xff] (!%p137_p2)  ;;  %341 = vmatprep.mubr.msk.f32.mxu0 (!%p137_p2), %vm374_vm0, %v375_v6  ;;  %p158_p3 = scmp.lt.s32.totalorder (!%p137_p2), %s317_s13, 7  ;;  %vm178_vm1 = vcmask (!%p137_p2), 261120   ;;  %v324_v9 = vld [vmem:[%s430_s2] ss:$0 sm:$0xff] (!%p137_p2) }
   0x7   : > { %v348_v7 = vpack.c.bf16 (!%p137_p2), %v170_v5, %v169_v2 }
   0x8   : > { %346 = vmatpush3.bf16.msra.mxu0 (!%p137_p2), %v345_v4 }
   0x9   : > { %347 = vmatprep.subr.bf16.mxu0 (!%p137_p2), %v373_v3 }
   0xc   : > { %349 = vmatpush3.bf16.msra.mxu0 (!%p137_p2), %v348_v7 }
   0xd   : > { %s433_s13 = smov (!%p158_p3, %s317_s13), 7 }
   0xe   : > { %s322_s22 = sshll.u32 %s433_s13, 3 }
   0xf   : > { %s161_s25 = scalar_lea.vmem %s428_s0, %s322_s22  ;;  %s165_s30 = scalar_lea.vmem %s431_s3, %s322_s22 }
  0x10   : > { %v166_v8 = vld [vmem:[%s161_s25] sm:$0xff] }
  0x11   : > { %342 = vmatmul.mubr.msk.f32.vlgmr.msra.gmra.mrb[0].mxu0 %vm178_vm1, %v166_v8 }
  0xe4   : > { %v248_v10 = vpop.f32.mrb[0].mxu0 }
  0xe5   : > { %v249_v11 = vadd.f32 %v324_v9, %v248_v10  ;;  %v343_v12 = vpop.f32.mrb[1].mxu0 }
  0xe7   : > { %252 = vmax.xlane.f32.xlu0 %v249_v11 }
 0x174   : > { %v253_v13 = vpop.xlane.xlu0 %252 }
 0x175   : > { %v254_v14 = vsub.f32 %v249_v11, %v253_v13 }
 0x177   : > { %v255_v15 = vmul.f32 1.442695, %v254_v14 }
 0x179   : > { %361 = vpow2.f32 %v255_v15 }
 0x183   : > { %v362_v16 = vpop.eup %361 }
 0x184   : > { %257 = vadd.xlane.f32.xlu0 %v362_v16 }
 0x211   : > { %v258_v17 = vpop.xlane.xlu0 %257 }
 0x212   : > { %363 = vlog2.f32 %v258_v17 }
 0x21c   : > { %v364_v18 = vpop.eup %363 }
 0x21d   : > { %v260_v19 = vmul.f32 0.6931472, %v364_v18 }
 0x21f   : > { %v261_v20 = vadd.f32 %v260_v19, %v253_v13 }
 0x221   : > { %v262_v21 = vsub.f32 %v249_v11, %v261_v20 }
 0x223   : > { %263 = vst [vmem:[%s165_s30] sm:$0xff] %v262_v21 }
 0x224 PF: > { %s13_s12 = sadd.s32 1, %s371_s12  }
 0x225   : > { %p10_p4 = scmp.ge.s32.totalorder %s13_s12, 10  }
 0x227   :  { %12 = sbr.rel (!%p10_p4) target bundleno = 1 (0x1), region = 62 }

// kernel: caption_gen_forward.2
= control target key start
LH: loop header
LB: loop body
LE: loop exit
PB: predicated region body
PF: predicated region fallthrough
CT: control target
= control target key end

     0   :  { %v1944_v0 = vmov 0.0|0.0   ;;  %vm1945_vm0 = vmmov 0   ;;  %v1946_v8 = vmov 0.0   ;;  %vm98_vm1 = vcmask 130048   ;;  %s1947_s29 = smov 64   ;;  %s1948_s30 = smov 32   ;;  %s2195_s2 = inlined_call_operand.vmem [shape: f32[32,128], index: 2, kind: input, shape index: {}]   ;;  %s2196_s1 = inlined_call_operand.vmem [shape: f32[16,128], index: 1, kind: input, shape index: {}]   ;;  %s2197_s0 = inlined_call_operand.vmem [shape: f32[8,8,16], index: 0, kind: input, shape index: {}]   ;;  %s2198_s3 = inlined_call_operand.vmem [shape: f32[1,128], index: 3, kind: input, shape index: {}]   ;;  %s2199_s4 = inlined_call_operand.vmem [shape: f32[8,8,32], index: 4, kind: output, shape index: {}]  }
   0x1   :  { %1803 = vmatprep.subr.bf16.mxu0 %v1944_v0  ;;  %v20_v1 = vld [vmem:[%s2195_s2] sm:$0xff]  ;;  %v21_v2 = vld [vmem:[%s2195_s2 + $0x8] sm:$0xff]  ;;  %1809 = vmatprep.subr.bf16.mxu1 %v1944_v0  ;;  %v22_v6 = vld [vmem:[%s2195_s2 + $0x10] sm:$0xff]  ;;  %vm24_vm2 = vcmask 261120  }
   0x2   :  { %v18_v3 = vld [vmem:[%s2196_s1] sm:$0xff]  ;;  %v1985_v4 = vpack.c.bf16 %v21_v2, %v20_v1  ;;  %v19_v5 = vld [vmem:[%s2196_s1 + $0x8] sm:$0xff]  ;;  %v23_v7 = vld [vmem:[%s2195_s2 + $0x18] sm:$0xff]  ;;  %1674 = vmatprep.mubr.msk.f32.mxu1 %vm1945_vm0, %v1946_v8  ;;  %1667 = vmatprep.mubr.msk.f32.mxu0 %vm1945_vm0, %v1946_v8 }
   0x3   :  { %v2000_v9 = vpack.c.bf16 %v19_v5, %v18_v3  ;;  %v2003_v10 = vpack.c.bf16 %v23_v7, %v22_v6  ;;  %v17_v11 = vld [vmem:[%s2197_s0] sm:$0xff]  ;;  %v1553_v29 = vld [vmem:[%s2197_s0 + $0x8] sm:$0xff]  ;;  %v1559_v50 = vld [vmem:[%s2197_s0 + $0x10] sm:$0xff] }
   0x4   :  { %1805 = vmatpush3.bf16.msra.mxu0 %v1985_v4  ;;  %v2028_v15 = vld [vmem:[%s2198_s3] ss:$0 sm:$0xff] }
   0x5   :  { %1806 = vmatprep.subr.bf16.mxu0 %v1944_v0  ;;  %1811 = vmatpush3.bf16.msra.mxu1 %v2000_v9 }
   0x6   :  { %1812 = vmatprep.subr.bf16.mxu1 %v1944_v0 }
   0x8   :  { %1808 = vmatpush3.bf16.msra.mxu0 %v2003_v10  ;;  %1675 = vmatmul.mubr.msk.f32.vlgmr.msra.gmra.mrb[0].mxu1 %vm98_vm1, %v17_v11 }
   0x9   :  { %1814 = vmatpush3.bf16.msra.mxu1 %v1985_v4  ;;  %1818 = vmatprep.subr.bf16.mxu0 %v1944_v0 }
   0xa   :  { %1815 = vmatprep.subr.bf16.mxu1 %v1944_v0  ;;  %1685 = vmatprep.mubr.msk.f32.mxu1 %vm1945_vm0, %v1946_v8 }
   0xb   :  { %1668 = vmatmul.mubr.f32.vlgmr.msra.gmra.mrb[0].mxu0 %v1946_v8 }
   0xc   :  { %1820 = vmatpush3.bf16.msra.mxu0 %v2000_v9  ;;  %1692 = vmatprep.mubr.msk.f32.mxu0 %vm1945_vm0, %v1946_v8 }
   0xd   :  { %1817 = vmatpush3.bf16.msra.mxu1 %v2003_v10  ;;  %1821 = vmatprep.subr.bf16.mxu0 %v1944_v0 }
   0xe   :  { %1827 = vmatprep.subr.bf16.mxu1 %v1944_v0 }
   0xf   :  { %1693 = vmatmul.mubr.msk.f32.vlgmr.msra.gmra.mrb[2].mxu0 %vm98_vm1, %v1553_v29 }
  0x10   :  { %1823 = vmatpush3.bf16.msra.mxu0 %v1985_v4  ;;  %1703 = vmatprep.mubr.msk.f32.mxu0 %vm1945_vm0, %v1946_v8 }
  0x11   :  { %1824 = vmatprep.subr.bf16.mxu0 %v1944_v0 }
  0x14   :  { %1826 = vmatpush3.bf16.msra.mxu0 %v2003_v10 }
  0x15   :  { %1836 = vmatprep.subr.bf16.mxu0 %v1944_v0 }
  0xdb   :  { %v168_v12 = vpop.f32.mrb[0].mxu1 }
  0xdc   :  { %v1676_v13 = vpop.f32.mrb[1].mxu1 }
  0xde   :  { %v94_v14 = vpop.f32.mrb[0].mxu0 }
  0xdf   :  { %v169_v16 = vadd.f32 %v168_v12, %v94_v14  ;;  %v1669_v17 = vpop.f32.mrb[1].mxu0  ;;  %v1565_v12 = vld [vmem:[%s2197_s0 + $0x18] sm:$0xff] }
  0xe1   :  { %v179_v18 = vadd.f32 %v2028_v15, %v169_v16 }
  0xe2   :  { %v358_v33 = vpop.f32.mrb[2].mxu0 }
  0xe3   :  { %1880 = vtanh.f32 %v179_v18  ;;  %v1552_v20 = vmul.f32 -1.442695, %v179_v18  ;;  %v1694_v34 = vpop.f32.mrb[3].mxu0 }
  0xe4   :  { %v1571_v34 = vld [vmem:[%s2197_s0 + $0x20] sm:$0xff] }
  0xe5   :  { %1882 = vpow2.f32 %v1552_v20 }
  0xed   :  { %v1881_v19 = vpop.eup %1880 }
  0xee   :  { %189 = vrot.lane.b32.xlu0 %v1881_v19, %s1947_s29 }
  0xef   :  { %v1883_v21 = vpop.eup %1882 }
  0xf0   :  { %v183_v22 = vadd.f32 1.0, %v1883_v21 }
  0xf2   :  { %1884 = vrcp.f32 %v183_v22 }
  0xfc   :  { %v1885_v23 = vpop.eup %1884 }
  0xfd   :  { %v187_v26 = vmul.f32 0.0, %v1885_v23 }
 0x160   :  { %v190_v24 = vpop.permute.xlu0 %189 }
 0x161   :  { %v192_v25 = vmul.f32 %v1885_v23, %v190_v24 }
 0x163   :  { %194 = vrot.lane.b32.xlu0 %v192_v25, %s1948_s30 }
 0x1d5   :  { %v195_v27 = vpop.permute.xlu0 %194 }
 0x1d6   :  { %v197_v28 = vadd.f32 %v195_v27, %v187_v26 }
 0x1d8   :  { %1886 = vtanh.f32 %v197_v28 }
 0x1e2   :  { %v1887_v30 = vpop.eup %1886 }
 0x1e3   :  { %200 = vrot.lane.b32.xlu1 %v1887_v30, %s1947_s29 }
 0x255   :  { %v201_v31 = vpop.permute.xlu1 %200 }
 0x256   :  { %v203_v32 = vmul.f32 %v1885_v23, %v201_v31 }
 0x258   :  { %205 = vrot.lane.b32.xlu1 %v203_v32, %s1948_s30 }
 0x2ca   :  { %v206_v35 = vpop.permute.xlu1 %205 }
 0x2cb   :  { %208 = vst.msk [vmem:[%s2199_s4] sm:$0xff] %vm24_vm2, %v206_v35  ;;  %1686 = vmatmul.mubr.msk.f32.vlgmr.msra.gmra.mrb[2].mxu1 %vm24_vm2, %v206_v35 }
 0x2cc   :  { %1829 = vmatpush3.bf16.msra.mxu1 %v2000_v9  ;;  %1710 = vmatprep.mubr.msk.f32.mxu1 %vm1945_vm0, %v1946_v8 }
 0x2cd   :  { %1830 = vmatprep.subr.bf16.mxu1 %v1944_v0 }
 0x2cf   :  { %1711 = vmatmul.mubr.msk.f32.vlgmr.msra.gmra.mrb[4].mxu1 %vm98_vm1, %v1559_v50 }
 0x2d0   :  { %1832 = vmatpush3.bf16.msra.mxu1 %v1985_v4  ;;  %1721 = vmatprep.mubr.msk.f32.mxu1 %vm1945_vm0, %v1946_v8 }
 0x2d1   :  { %1833 = vmatprep.subr.bf16.mxu1 %v1944_v0 }
 0x2d4   :  { %1835 = vmatpush3.bf16.msra.mxu1 %v2003_v10 }
 0x2d5   :  { %1845 = vmatprep.subr.bf16.mxu1 %v1944_v0 }
 0x39e   :  { %v285_v36 = vpop.f32.mrb[2].mxu1 }
 0x39f   :  { %v359_v37 = vadd.f32 %v358_v33, %v285_v36  ;;  %v1687_v38 = vpop.f32.mrb[3].mxu1 }
 0x3a1   :  { %v369_v39 = vadd.f32 %v2028_v15, %v359_v37 }
 0x3a2   :  { %v549_v54 = vpop.f32.mrb[4].mxu1 }
 0x3a3   :  { %1888 = vtanh.f32 %v369_v39  ;;  %v1557_v41 = vmul.f32 -1.442695, %v369_v39  ;;  %v1712_v55 = vpop.f32.mrb[5].mxu1 }
 0x3a4   :  { %v1577_v55 = vld [vmem:[%s2197_s0 + $0x28] sm:$0xff] }
 0x3a5   :  { %1890 = vpow2.f32 %v1557_v41 }
 0x3ad   :  { %v1889_v40 = vpop.eup %1888 }
 0x3ae   :  { %379 = vrot.lane.b32.xlu0 %v1889_v40, %s1947_s29 }
 0x3af   :  { %v1891_v42 = vpop.eup %1890 }
 0x3b0   :  { %v373_v43 = vadd.f32 1.0, %v1891_v42 }
 0x3b2   :  { %1892 = vrcp.f32 %v373_v43 }
 0x3bc   :  { %v1893_v44 = vpop.eup %1892 }
 0x3bd   :  { %v377_v47 = vmul.f32 %v1893_v44, %v197_v28 }
 0x420   :  { %v380_v45 = vpop.permute.xlu0 %379 }
 0x421   :  { %v382_v46 = vmul.f32 %v1893_v44, %v380_v45 }
 0x423   :  { %384 = vrot.lane.b32.xlu1 %v382_v46, %s1948_s30 }
 0x495   :  { %v385_v48 = vpop.permute.xlu1 %384 }
 0x496   :  { %v387_v49 = vadd.f32 %v385_v48, %v377_v47 }
 0x498   :  { %1894 = vtanh.f32 %v387_v49 }
 0x4a2   :  { %v1895_v51 = vpop.eup %1894 }
 0x4a3   :  { %390 = vrot.lane.b32.xlu0 %v1895_v51, %s1947_s29 }
 0x515   :  { %v391_v52 = vpop.permute.xlu0 %390 }
 0x516   :  { %v393_v53 = vmul.f32 %v1893_v44, %v391_v52 }
 0x518   :  { %395 = vrot.lane.b32.xlu1 %v393_v53, %s1948_s30 }
 0x58a   :  { %v396_v56 = vpop.permute.xlu1 %395 }
 0x58b   :  { %1558 = vst.msk [vmem:[%s2199_s4 + $0x8] sm:$0xff] %vm24_vm2, %v396_v56  ;;  %1704 = vmatmul.mubr.msk.f32.vlgmr.msra.gmra.mrb[4].mxu0 %vm24_vm2, %v396_v56 }
 0x58c   :  { %1838 = vmatpush3.bf16.msra.mxu0 %v2000_v9  ;;  %1728 = vmatprep.mubr.msk.f32.mxu0 %vm1945_vm0, %v1946_v8 }
 0x58d   :  { %1839 = vmatprep.subr.bf16.mxu0 %v1944_v0 }
 0x58f   :  { %1729 = vmatmul.mubr.msk.f32.vlgmr.msra.gmra.mrb[6].mxu0 %vm98_vm1, %v1565_v12 }
 0x590   :  { %1841 = vmatpush3.bf16.msra.mxu0 %v1985_v4  ;;  %1739 = vmatprep.mubr.msk.f32.mxu0 %vm1945_vm0, %v1946_v8 }
 0x591   :  { %1842 = vmatprep.subr.bf16.mxu0 %v1944_v0 }
 0x594   :  { %1844 = vmatpush3.bf16.msra.mxu0 %v2003_v10 }
 0x595   :  { %1854 = vmatprep.subr.bf16.mxu0 %v1944_v0 }
 0x65e   :  { %v476_v57 = vpop.f32.mrb[4].mxu0 }
 0x65f   :  { %v550_v58 = vadd.f32 %v549_v54, %v476_v57  ;;  %v1705_v59 = vpop.f32.mrb[5].mxu0 }
 0x661   :  { %v560_v60 = vadd.f32 %v2028_v15, %v550_v58 }
 0x662   :  { %v740_v17 = vpop.f32.mrb[6].mxu0 }
 0x663   :  { %1896 = vtanh.f32 %v560_v60  ;;  %v1563_v62 = vmul.f32 -1.442695, %v560_v60  ;;  %v1730_v18 = vpop.f32.mrb[7].mxu0 }
 0x664   :  { %v1583_v18 = vld [vmem:[%s2197_s0 + $0x30] sm:$0xff] }
 0x665   :  { %1898 = vpow2.f32 %v1563_v62 }
 0x66d   :  { %v1897_v61 = vpop.eup %1896 }
 0x66e   :  { %570 = vrot.lane.b32.xlu0 %v1897_v61, %s1947_s29 }
 0x66f   :  { %v1899_v63 = vpop.eup %1898 }
 0x670   :  { %v564_v1 = vadd.f32 1.0, %v1899_v63 }
 0x672   :  { %1900 = vrcp.f32 %v564_v1 }
 0x67c   :  { %v1901_v2 = vpop.eup %1900 }
 0x67d   :  { %v568_v6 = vmul.f32 %v1901_v2, %v387_v49 }
 0x6e0   :  { %v571_v3 = vpop.permute.xlu0 %570 }
 0x6e1   :  { %v573_v5 = vmul.f32 %v1901_v2, %v571_v3 }
 0x6e3   :  { %575 = vrot.lane.b32.xlu1 %v573_v5, %s1948_s30 }
 0x755   :  { %v576_v7 = vpop.permute.xlu1 %575 }
 0x756   :  { %v578_v11 = vadd.f32 %v576_v7, %v568_v6 }
 0x758   :  { %1902 = vtanh.f32 %v578_v11 }
 0x762   :  { %v1903_v13 = vpop.eup %1902 }
 0x763   :  { %581 = vrot.lane.b32.xlu0 %v1903_v13, %s1947_s29 }
 0x7d5   :  { %v582_v14 = vpop.permute.xlu0 %581 }
 0x7d6   :  { %v584_v16 = vmul.f32 %v1901_v2, %v582_v14 }
 0x7d8   :  { %586 = vrot.lane.b32.xlu1 %v584_v16, %s1948_s30 }
 0x84a   :  { %v587_v19 = vpop.permute.xlu1 %586 }
 0x84b   :  { %1564 = vst.msk [vmem:[%s2199_s4 + $0x10] sm:$0xff] %vm24_vm2, %v587_v19  ;;  %1722 = vmatmul.mubr.msk.f32.vlgmr.msra.gmra.mrb[6].mxu1 %vm24_vm2, %v587_v19 }
 0x84c   :  { %1847 = vmatpush3.bf16.msra.mxu1 %v2000_v9  ;;  %1746 = vmatprep.mubr.msk.f32.mxu1 %vm1945_vm0, %v1946_v8 }
 0x84d   :  { %1848 = vmatprep.subr.bf16.mxu1 %v1944_v0 }
 0x84f   :  { %1747 = vmatmul.mubr.msk.f32.vlgmr.msra.gmra.mrb[8].mxu1 %vm98_vm1, %v1571_v34  ;;  %v1589_v34 = vld [vmem:[%s2197_s0 + $0x38] sm:$0xff] }
 0x850   :  { %1850 = vmatpush3.bf16.msra.mxu1 %v1985_v4  ;;  %1757 = vmatprep.mubr.msk.f32.mxu1 %vm1945_vm0, %v1946_v8 }
 0x851   :  { %1851 = vmatprep.subr.bf16.mxu1 %v1944_v0 }
 0x854   :  { %1853 = vmatpush3.bf16.msra.mxu1 %v2003_v10 }
 0x855   :  { %1863 = vmatprep.subr.bf16.mxu1 %v1944_v0 }
 0x91e   :  { %v667_v20 = vpop.f32.mrb[6].mxu1 }
 0x91f   :  { %v741_v21 = vadd.f32 %v740_v17, %v667_v20  ;;  %v1723_v22 = vpop.f32.mrb[7].mxu1 }
 0x921   :  { %v751_v23 = vadd.f32 %v2028_v15, %v741_v21 }
 0x922   :  { %v931_v38 = vpop.f32.mrb[8].mxu1 }
 0x923   :  { %1904 = vtanh.f32 %v751_v23  ;;  %v1569_v25 = vmul.f32 -1.442695, %v751_v23  ;;  %v1748_v39 = vpop.f32.mrb[9].mxu1 }
 0x925   :  { %1906 = vpow2.f32 %v1569_v25 }
 0x92d   :  { %v1905_v24 = vpop.eup %1904 }
 0x92e   :  { %761 = vrot.lane.b32.xlu0 %v1905_v24, %s1947_s29 }
 0x92f   :  { %v1907_v26 = vpop.eup %1906 }
 0x930   :  { %v755_v27 = vadd.f32 1.0, %v1907_v26 }
 0x932   :  { %1908 = vrcp.f32 %v755_v27 }
 0x93c   :  { %v1909_v28 = vpop.eup %1908 }
 0x93d   :  { %v759_v31 = vmul.f32 %v1909_v28, %v578_v11 }
 0x9a0   :  { %v762_v29 = vpop.permute.xlu0 %761 }
 0x9a1   :  { %v764_v30 = vmul.f32 %v1909_v28, %v762_v29 }
 0x9a3   :  { %766 = vrot.lane.b32.xlu1 %v764_v30, %s1948_s30 }
 0xa15   :  { %v767_v32 = vpop.permute.xlu1 %766 }
 0xa16   :  { %v769_v33 = vadd.f32 %v767_v32, %v759_v31 }
 0xa18   :  { %1910 = vtanh.f32 %v769_v33 }
 0xa22   :  { %v1911_v35 = vpop.eup %1910 }
 0xa23   :  { %772 = vrot.lane.b32.xlu0 %v1911_v35, %s1947_s29 }
 0xa95   :  { %v773_v36 = vpop.permute.xlu0 %772 }
 0xa96   :  { %v775_v37 = vmul.f32 %v1909_v28, %v773_v36 }
 0xa98   :  { %777 = vrot.lane.b32.xlu1 %v775_v37, %s1948_s30 }
 0xb0a   :  { %v778_v40 = vpop.permute.xlu1 %777 }
 0xb0b   :  { %1570 = vst.msk [vmem:[%s2199_s4 + $0x18] sm:$0xff] %vm24_vm2, %v778_v40  ;;  %1740 = vmatmul.mubr.msk.f32.vlgmr.msra.gmra.mrb[8].mxu0 %vm24_vm2, %v778_v40 }
 0xb0c   :  { %1856 = vmatpush3.bf16.msra.mxu0 %v2000_v9  ;;  %1764 = vmatprep.mubr.msk.f32.mxu0 %vm1945_vm0, %v1946_v8 }
 0xb0d   :  { %1857 = vmatprep.subr.bf16.mxu0 %v1944_v0 }
 0xb0f   :  { %1765 = vmatmul.mubr.msk.f32.vlgmr.msra.gmra.mrb[10].mxu0 %vm98_vm1, %v1577_v55 }
 0xb10   :  { %1859 = vmatpush3.bf16.msra.mxu0 %v1985_v4  ;;  %1775 = vmatprep.mubr.msk.f32.mxu0 %vm1945_vm0, %v1946_v8 }
 0xb11   :  { %1860 = vmatprep.subr.bf16.mxu0 %v1944_v0 }
 0xb14   :  { %1862 = vmatpush3.bf16.msra.mxu0 %v2003_v10 }
 0xb15   :  { %1872 = vmatprep.subr.bf16.mxu0 %v1944_v0 }
 0xbde   :  { %v858_v41 = vpop.f32.mrb[8].mxu0 }
 0xbdf   :  { %v932_v42 = vadd.f32 %v931_v38, %v858_v41  ;;  %v1741_v43 = vpop.f32.mrb[9].mxu0 }
 0xbe1   :  { %v942_v44 = vadd.f32 %v2028_v15, %v932_v42 }
 0xbe2   :  { %v1122_v59 = vpop.f32.mrb[10].mxu0 }
 0xbe3   :  { %1912 = vtanh.f32 %v942_v44  ;;  %v1575_v46 = vmul.f32 -1.442695, %v942_v44  ;;  %v1766_v60 = vpop.f32.mrb[11].mxu0 }
 0xbe5   :  { %1914 = vpow2.f32 %v1575_v46 }
 0xbed   :  { %v1913_v45 = vpop.eup %1912 }
 0xbee   :  { %952 = vrot.lane.b32.xlu0 %v1913_v45, %s1947_s29 }
 0xbef   :  { %v1915_v47 = vpop.eup %1914 }
 0xbf0   :  { %v946_v48 = vadd.f32 1.0, %v1915_v47 }
 0xbf2   :  { %1916 = vrcp.f32 %v946_v48 }
 0xbfc   :  { %v1917_v49 = vpop.eup %1916 }
 0xbfd   :  { %v950_v52 = vmul.f32 %v1917_v49, %v769_v33 }
 0xc60   :  { %v953_v50 = vpop.permute.xlu0 %952 }
 0xc61   :  { %v955_v51 = vmul.f32 %v1917_v49, %v953_v50 }
 0xc63   :  { %957 = vrot.lane.b32.xlu1 %v955_v51, %s1948_s30 }
 0xcd5   :  { %v958_v53 = vpop.permute.xlu1 %957 }
 0xcd6   :  { %v960_v54 = vadd.f32 %v958_v53, %v950_v52 }
 0xcd8   :  { %1918 = vtanh.f32 %v960_v54 }
 0xce2   :  { %v1919_v56 = vpop.eup %1918 }
 0xce3   :  { %963 = vrot.lane.b32.xlu0 %v1919_v56, %s1947_s29 }
 0xd55   :  { %v964_v57 = vpop.permute.xlu0 %963 }
 0xd56   :  { %v966_v58 = vmul.f32 %v1917_v49, %v964_v57 }
 0xd58   :  { %968 = vrot.lane.b32.xlu1 %v966_v58, %s1948_s30 }
 0xdca   :  { %v969_v61 = vpop.permute.xlu1 %968 }
 0xdcb   :  { %1576 = vst.msk [vmem:[%s2199_s4 + $0x20] sm:$0xff] %vm24_vm2, %v969_v61  ;;  %1758 = vmatmul.mubr.msk.f32.vlgmr.msra.gmra.mrb[10].mxu1 %vm24_vm2, %v969_v61 }
 0xdcc   :  { %1865 = vmatpush3.bf16.msra.mxu1 %v2000_v9  ;;  %1782 = vmatprep.mubr.msk.f32.mxu1 %vm1945_vm0, %v1946_v8 }
 0xdcd   :  { %1866 = vmatprep.subr.bf16.mxu1 %v1944_v0 }
 0xdcf   :  { %1783 = vmatmul.mubr.msk.f32.vlgmr.msra.gmra.mrb[12].mxu1 %vm98_vm1, %v1583_v18 }
 0xdd0   :  { %1868 = vmatpush3.bf16.msra.mxu1 %v1985_v4  ;;  %1793 = vmatprep.mubr.msk.f32.mxu1 %vm1945_vm0, %v1946_v8 }
 0xdd1   :  { %1869 = vmatprep.subr.bf16.mxu1 %v1944_v0 }
 0xdd4   :  { %1871 = vmatpush3.bf16.msra.mxu1 %v2003_v10 }
 0xe9e   :  { %v1049_v62 = vpop.f32.mrb[10].mxu1 }
 0xe9f   :  { %v1123_v63 = vadd.f32 %v1122_v59, %v1049_v62  ;;  %v1759_v1 = vpop.f32.mrb[11].mxu1 }
 0xea1   :  { %v1133_v2 = vadd.f32 %v2028_v15, %v1123_v63 }
 0xea2   :  { %v1313_v22 = vpop.f32.mrb[12].mxu1 }
 0xea3   :  { %1920 = vtanh.f32 %v1133_v2  ;;  %v1581_v5 = vmul.f32 -1.442695, %v1133_v2  ;;  %v1784_v23 = vpop.f32.mrb[13].mxu1 }
 0xea5   :  { %1922 = vpow2.f32 %v1581_v5 }
 0xead   :  { %v1921_v3 = vpop.eup %1920 }
 0xeae   :  { %1143 = vrot.lane.b32.xlu0 %v1921_v3, %s1947_s29 }
 0xeaf   :  { %v1923_v6 = vpop.eup %1922 }
 0xeb0   :  { %v1137_v7 = vadd.f32 1.0, %v1923_v6 }
 0xeb2   :  { %1924 = vrcp.f32 %v1137_v7 }
 0xebc   :  { %v1925_v11 = vpop.eup %1924 }
 0xebd   :  { %v1141_v14 = vmul.f32 %v1925_v11, %v960_v54 }
 0xf20   :  { %v1144_v12 = vpop.permute.xlu0 %1143 }
 0xf21   :  { %v1146_v13 = vmul.f32 %v1925_v11, %v1144_v12 }
 0xf23   :  { %1148 = vrot.lane.b32.xlu1 %v1146_v13, %s1948_s30 }
 0xf95   :  { %v1149_v16 = vpop.permute.xlu1 %1148 }
 0xf96   :  { %v1151_v17 = vadd.f32 %v1149_v16, %v1141_v14 }
 0xf98   :  { %1926 = vtanh.f32 %v1151_v17 }
 0xfa2   :  { %v1927_v19 = vpop.eup %1926 }
 0xfa3   :  { %1154 = vrot.lane.b32.xlu0 %v1927_v19, %s1947_s29 }
0x1015   :  { %v1155_v20 = vpop.permute.xlu0 %1154 }
0x1016   :  { %v1157_v21 = vmul.f32 %v1925_v11, %v1155_v20 }
0x1018   :  { %1159 = vrot.lane.b32.xlu1 %v1157_v21, %s1948_s30 }
0x108a   :  { %v1160_v24 = vpop.permute.xlu1 %1159 }
0x108b   :  { %1582 = vst.msk [vmem:[%s2199_s4 + $0x28] sm:$0xff] %vm24_vm2, %v1160_v24  ;;  %1776 = vmatmul.mubr.msk.f32.vlgmr.msra.gmra.mrb[12].mxu0 %vm24_vm2, %v1160_v24 }
0x108c   :  { %1874 = vmatpush3.bf16.msra.mxu0 %v2000_v9  ;;  %1800 = vmatprep.mubr.msk.f32.mxu0 %vm1945_vm0, %v1946_v8 }
0x108f   :  { %1801 = vmatmul.mubr.msk.f32.vlgmr.msra.gmra.mrb[14].mxu0 %vm98_vm1, %v1589_v34 }
0x115e   :  { %v1240_v0 = vpop.f32.mrb[12].mxu0 }
0x115f   :  { %v1314_v4 = vadd.f32 %v1313_v22, %v1240_v0  ;;  %v1777_v10 = vpop.f32.mrb[13].mxu0 }
0x1161   :  { %v1324_v25 = vadd.f32 %v2028_v15, %v1314_v4 }
0x1162   :  { %v1504_v38 = vpop.f32.mrb[14].mxu0 }
0x1163   :  { %1928 = vtanh.f32 %v1324_v25  ;;  %v1587_v27 = vmul.f32 -1.442695, %v1324_v25  ;;  %v1802_v39 = vpop.f32.mrb[15].mxu0 }
0x1165   :  { %1930 = vpow2.f32 %v1587_v27 }
0x116d   :  { %v1929_v26 = vpop.eup %1928 }
0x116e   :  { %1334 = vrot.lane.b32.xlu0 %v1929_v26, %s1947_s29 }
0x116f   :  { %v1931_v28 = vpop.eup %1930 }
0x1170   :  { %v1328_v29 = vadd.f32 1.0, %v1931_v28 }
0x1172   :  { %1932 = vrcp.f32 %v1328_v29 }
0x117c   :  { %v1933_v30 = vpop.eup %1932 }
0x117d   :  { %v1332_v8 = vmul.f32 %v1933_v30, %v1151_v17 }
0x11e0   :  { %v1335_v31 = vpop.permute.xlu0 %1334 }
0x11e1   :  { %v1337_v9 = vmul.f32 %v1933_v30, %v1335_v31 }
0x11e3   :  { %1339 = vrot.lane.b32.xlu1 %v1337_v9, %s1948_s30 }
0x1255   :  { %v1340_v32 = vpop.permute.xlu1 %1339 }
0x1256   :  { %v1342_v33 = vadd.f32 %v1340_v32, %v1332_v8 }
0x1258   :  { %1934 = vtanh.f32 %v1342_v33 }
0x1262   :  { %v1935_v35 = vpop.eup %1934 }
0x1263   :  { %1345 = vrot.lane.b32.xlu0 %v1935_v35, %s1947_s29 }
0x12d5   :  { %v1346_v36 = vpop.permute.xlu0 %1345 }
0x12d6   :  { %v1348_v37 = vmul.f32 %v1933_v30, %v1346_v36 }
0x12d8   :  { %1350 = vrot.lane.b32.xlu1 %v1348_v37, %s1948_s30 }
0x134a   :  { %v1351_v40 = vpop.permute.xlu1 %1350 }
0x134b   :  { %1588 = vst.msk [vmem:[%s2199_s4 + $0x30] sm:$0xff] %vm24_vm2, %v1351_v40  ;;  %1794 = vmatmul.mubr.msk.f32.vlgmr.msra.gmra.mrb[14].mxu1 %vm24_vm2, %v1351_v40 }
0x141e   :  { %v1431_v41 = vpop.f32.mrb[14].mxu1 }
0x141f   :  { %v1505_v42 = vadd.f32 %v1504_v38, %v1431_v41  ;;  %v1795_v43 = vpop.f32.mrb[15].mxu1 }
0x1421   :  { %v1515_v44 = vadd.f32 %v2028_v15, %v1505_v42 }
0x1423   :  { %1936 = vtanh.f32 %v1515_v44  ;;  %v1593_v46 = vmul.f32 -1.442695, %v1515_v44 }
0x1425   :  { %1938 = vpow2.f32 %v1593_v46 }
0x142d   :  { %v1937_v45 = vpop.eup %1936 }
0x142e   :  { %1525 = vrot.lane.b32.xlu0 %v1937_v45, %s1947_s29 }
0x142f   :  { %v1939_v47 = vpop.eup %1938 }
0x1430   :  { %v1519_v48 = vadd.f32 1.0, %v1939_v47 }
0x1432   :  { %1940 = vrcp.f32 %v1519_v48 }
0x143c   :  { %v1941_v49 = vpop.eup %1940 }
0x143d   :  { %v1523_v52 = vmul.f32 %v1941_v49, %v1342_v33 }
0x14a0   :  { %v1526_v50 = vpop.permute.xlu0 %1525 }
0x14a1   :  { %v1528_v51 = vmul.f32 %v1941_v49, %v1526_v50 }
0x14a3   :  { %1530 = vrot.lane.b32.xlu1 %v1528_v51, %s1948_s30 }
0x1515   :  { %v1531_v53 = vpop.permute.xlu1 %1530 }
0x1516   :  { %v1533_v54 = vadd.f32 %v1531_v53, %v1523_v52 }
0x1518   :  { %1942 = vtanh.f32 %v1533_v54 }
0x1522   :  { %v1943_v55 = vpop.eup %1942 }
0x1523   :  { %1536 = vrot.lane.b32.xlu0 %v1943_v55, %s1947_s29 }
0x1595   :  { %v1537_v15 = vpop.permute.xlu0 %1536 }
0x1596   :  { %v1539_v56 = vmul.f32 %v1941_v49, %v1537_v15 }
0x1598   :  { %1541 = vrot.lane.b32.xlu1 %v1539_v56, %s1948_s30 }
0x160a   :  { %v1542_v57 = vpop.permute.xlu1 %1541 }
0x160b   :  { %1594 = vst.msk [vmem:[%s2199_s4 + $0x38] sm:$0xff] %vm24_vm2, %v1542_v57 }

</bundles_post_ra>
